<compile_context>
chip_gen: v7x
topology: tpu7x:2x2x1
jax: 0.10.0
libtpu: 0.0.40
codegen_flags: <defaults>
</compile_context>

<pallas_src>
import functools

import jax
import jax.numpy as jnp
from jax.experimental import pallas as pl
from jax.experimental.pallas import tpu as pltpu


# ----------------------------- kernel ---------------------------------------


def gated_abmil_kernel(h_ref, wvu_ref, bvu_ref, wwt_ref, bw_ref, wc_ref, bc_ref,
                       y_ref, a_ref,
                       m_ref, l_ref, acc_ref,
                       *, n_valid, tile_n, d_inner):
    i = pl.program_id(0)
    n_tiles = pl.num_programs(0)

    @pl.when(i == 0)
    def _init():
        m_ref[...] = jnp.full_like(m_ref, -jnp.inf)
        l_ref[...] = jnp.zeros_like(l_ref)
        acc_ref[...] = jnp.zeros_like(acc_ref)

    H = h_ref[...]                                                  # (TN, M), input dtype

    # Fused gating matmul: one MXU pass produces both branches (TN, 2L) in f32.
    G = jnp.dot(H, wvu_ref[...], preferred_element_type=jnp.float32) + bvu_ref[...]
    gated = jnp.tanh(G[:, :d_inner]) * jax.nn.sigmoid(G[:, d_inner:])   # (TN, L) f32

    # Lane-major attention logits: (1, TN) = Ww^T (1, L) . gated^T (contract L).
    scores = jax.lax.dot_general(
        wwt_ref[...], gated,
        dimension_numbers=(((1,), (1,)), ((), ())),
        preferred_element_type=jnp.float32,
    ) + bw_ref[0]                                                   # (1, TN)

    # Mask rows beyond the true bag size (H tail is zero-padded in the wrapper).
    row_ids = i * tile_n + jax.lax.broadcasted_iota(jnp.int32, (1, tile_n), 1)
    scores = jnp.where(row_ids < n_valid, scores, -jnp.inf)

    # Stash raw scores lane-dense; normalized in place on the last step.
    a_ref[pl.ds(i, 1), :] = scores

    # Online-softmax update + MXU accumulation of the unnormalized bag embedding.
    m_old = m_ref[...]                                              # (1, 1)
    m_new = jnp.maximum(m_old, jnp.max(scores, axis=-1, keepdims=True))
    alpha = jnp.exp(m_old - m_new)                                  # (1, 1)
    p = jnp.exp(scores - m_new)                                     # (1, TN); padded -> 0
    l_ref[...] = l_ref[...] * alpha + jnp.sum(p, axis=-1, keepdims=True)
    acc_ref[...] = acc_ref[...] * alpha + jnp.dot(
        p.astype(H.dtype), H, preferred_element_type=jnp.float32)   # (1, M) f32
    m_ref[...] = m_new

    @pl.when(i == n_tiles - 1)
    def _finalize():
        inv_l = 1.0 / l_ref[...]                                    # (1, 1) f32
        # Normalized attention over the whole (padded) bag, lane-dense.
        a_ref[...] = jnp.exp(a_ref[...] - m_ref[...]) * inv_l
        Z = acc_ref[...] * inv_l                                    # (1, M) f32
        y_ref[...] = (jnp.dot(Z, wc_ref[...], preferred_element_type=jnp.float32)
                      + bc_ref[...])                                # (1, n_class)


# ----------------------------- wrapper ---------------------------------------


def _round_up(x, m):
    return ((x + m - 1) // m) * m


def _vmem_capacity_bytes():
    try:
        return int(pltpu.get_tpu_info().vmem_capacity_bytes)
    except Exception:
        return 64 * 1024 * 1024        # conservative default (v7x-sized)


def _vmem_limit_bytes(vmem_cap):
    # Raise the scoped limit on 128 MiB parts (v5e/v6e), keep v7x conservative.
    return 64 * 1024 * 1024 if vmem_cap >= 128 * 1024 * 1024 else 32 * 1024 * 1024


def _choose_tile_n(n, m, itemsize, vmem_cap):
    # Bigger H tiles where VMEM is plentiful (v5e/v6e 128 MiB) than on v7x (64 MiB);
    # double-buffered (TN, M) tiles must leave room for the resident weights.
    target_bytes = (4 if vmem_cap >= 128 * 1024 * 1024 else 2) * 1024 * 1024
    tn = target_bytes // max(1, m * itemsize)
    tn = (tn // 8) * 8
    tn = max(8, min(tn, 4096))
    return min(tn, _round_up(n, 8))


def gated_abmil_forward(x, params, return_att=False, tile_n=None):
    """x: (1, N, M). params: packed/pre-transposed weights (see init_params)."""
    H = jnp.squeeze(x, axis=0)                                      # (N, M)
    N, M = H.shape
    L = params["wvu"].shape[1] // 2
    C = params["wc"].shape[1]

    vmem_cap = _vmem_capacity_bytes()
    TN = tile_n if tile_n is not None else _choose_tile_n(
        N, M, H.dtype.itemsize, vmem_cap)
    num_tiles = pl.cdiv(N, TN)
    n_pad = num_tiles * TN
    if n_pad != N:
        H = jnp.pad(H, ((0, n_pad - N), (0, 0)))                    # zero-pad tail rows

    kernel = functools.partial(
        gated_abmil_kernel, n_valid=N, tile_n=TN, d_inner=L)

    grid_spec = pltpu.PrefetchScalarGridSpec(
        num_scalar_prefetch=0,
        grid=(num_tiles,),
        in_specs=[
            pl.BlockSpec((TN, M), lambda i: (i, 0)),                 # H: streamed over N
            pl.BlockSpec((M, 2 * L), lambda i: (0, 0)),              # Wvu: resident
            pl.BlockSpec((1, 2 * L), lambda i: (0, 0)),              # bvu: resident
            pl.BlockSpec((1, L), lambda i: (0, 0)),                  # Ww^T: resident
            pl.BlockSpec(memory_space=pltpu.MemorySpace.SMEM),       # bw: scalar in SMEM
            pl.BlockSpec((M, C), lambda i: (0, 0)),                  # Wc: resident
            pl.BlockSpec((1, C), lambda i: (0, 0)),                  # bc: resident
        ],
        out_specs=(
            pl.BlockSpec((1, C), lambda i: (0, 0)),                  # Y (written last step)
            pl.BlockSpec((num_tiles, TN), lambda i: (0, 0)),         # attention, lane-dense
        ),
        scratch_shapes=[
            pltpu.VMEM((1, 1), jnp.float32),                         # running max
            pltpu.VMEM((1, 1), jnp.float32),                         # running normalizer
            pltpu.VMEM((1, M), jnp.float32),                         # unnormalized Z
        ],
    )

    y_prob, att = pl.pallas_call(
        kernel,
        out_shape=(
            jax.ShapeDtypeStruct((1, C), jnp.float32),
            jax.ShapeDtypeStruct((num_tiles, TN), jnp.float32),
        ),
        grid_spec=grid_spec,
        compiler_params=pltpu.CompilerParams(
            dimension_semantics=("arbitrary",),
            vmem_limit_bytes=_vmem_limit_bytes(vmem_cap),
        ),
    )(H, params["wvu"], params["bvu"], params["wwt"], params["bw"],
      params["wc"], params["bc"])

    att = att.reshape(1, n_pad)[:, :N]                               # (1, N), no transpose
    if return_att:
        return y_prob, att
    return y_prob


# ----------------------------- params / reference ----------------------------


def init_params(key, M, L, C):
    """Deterministic synthetic params (PyTorch Linear init), packed for the kernel."""
    ks = jax.random.split(key, 8)

    def lin(kw, kb, fan_in, fan_out):
        bound = 1.0 / (float(fan_in) ** 0.5)
        w = jax.random.uniform(kw, (fan_in, fan_out), jnp.float32, -bound, bound)
        b = jax.random.uniform(kb, (1, fan_out), jnp.float32, -bound, bound)
        return w, b

    wv, bv = lin(ks[0], ks[1], M, L)     # attention_V: Linear(M, L)
    wu, bu = lin(ks[2], ks[3], M, L)     # attention_U: Linear(M, L)
    ww, bw = lin(ks[4], ks[5], L, 1)     # attention_w: Linear(L, 1)
    wc, bc = lin(ks[6], ks[7], M, C)     # classifier:  Linear(M, n_class)
    return {
        "wvu": jnp.concatenate([wv, wu], axis=1),   # (M, 2L) fused gating weight
        "bvu": jnp.concatenate([bv, bu], axis=1),   # (1, 2L)
        "wwt": ww.T,                                # (1, L) == attention_w.weight
        "bw": bw.reshape(1),                        # (1,) scalar bias (SMEM)
        "wc": wc,                                   # (M, C)
        "bc": bc,                                   # (1, C)
    }


def reference_forward(x, params):
    """Pure-JAX reference for correctness checks."""
    H = jnp.squeeze(x, axis=0).astype(jnp.float32)
    L = params["wvu"].shape[1] // 2
    G = H @ params["wvu"] + params["bvu"]
    gated = jnp.tanh(G[:, :L]) * jax.nn.sigmoid(G[:, L:])
    s = gated @ params["wwt"].T + params["bw"][0]                    # (N, 1)
    A = jax.nn.softmax(s.T, axis=1)                                  # (1, N)
    Z = A @ H                                                        # (1, M)
    Y = Z @ params["wc"] + params["bc"]                              # (1, C)
    return Y, A


# ----------------------------- test ------------------------------------------


if __name__ == "__main__":
    # conf.D_feat = 32, conf.D_inner = 16, conf.n_class = 4; bag of N = 20 instances
    # (deliberately NOT a multiple of the tile to exercise masking/padding).
    M, L, C, N = 32, 16, 4, 20
    key = jax.random.PRNGKey(0)
    k_x, k_p = jax.random.split(key)
    x = jax.random.normal(k_x, (1, N, M), jnp.float32)
    params = init_params(k_p, M, L, C)

    y_ref, a_ref_ = reference_forward(x, params)

    # 1) auto tile size (single tile covers the whole toy bag).
    y1, a1 = gated_abmil_forward(x, params, return_att=True)
    y1 = jax.block_until_ready(y1)
    a1 = jax.block_until_ready(a1)

    # 2) forced small tile -> multi-step grid, online softmax + padded last tile.
    y2, a2 = gated_abmil_forward(x, params, return_att=True, tile_n=8)
    y2 = jax.block_until_ready(y2)
    a2 = jax.block_until_ready(a2)

    for y, a in ((y1, a1), (y2, a2)):
        assert y.shape == (1, C)
        assert a.shape == (1, N)
        assert jnp.allclose(y, y_ref, atol=1e-5, rtol=1e-4), "logits mismatch vs reference"
        assert jnp.allclose(a, a_ref_, atol=1e-5, rtol=1e-4), "attention mismatch vs reference"
        assert jnp.allclose(jnp.sum(a), 1.0, atol=1e-5), "attention not normalized"

    print("KERNEL_OK")
</pallas_src>

<mosaic_0001>
module attributes {stable_mosaic.version = 11 : i64} {
  func.func @gated_abmil_kernel(%arg0: i32, %arg1: memref<24x32xf32, #tpu.memory_space<vmem>>, %arg2: memref<32x32xf32, #tpu.memory_space<vmem>>, %arg3: memref<1x32xf32, #tpu.memory_space<vmem>>, %arg4: memref<1x16xf32, #tpu.memory_space<vmem>>, %arg5: memref<1xf32, #tpu.memory_space<smem>>, %arg6: memref<32x4xf32, #tpu.memory_space<vmem>>, %arg7: memref<1x4xf32, #tpu.memory_space<vmem>>, %arg8: memref<1x4xf32, #tpu.memory_space<vmem>>, %arg9: memref<1x24xf32, #tpu.memory_space<vmem>>, %arg10: memref<1x1xf32, #tpu.memory_space<vmem>>, %arg11: memref<1x1xf32, #tpu.memory_space<vmem>>, %arg12: memref<1x32xf32, #tpu.memory_space<vmem>>) attributes {dimension_semantics = [#tpu.dimension_semantics<arbitrary>], iteration_bounds = array<i64: 1>, scalar_prefetch = 0 : i64, scratch_operands = 3 : i64, tpu.core_type = #tpu.core_type<tc>, window_params = [{transform_indices = @transform_0, window_bounds = array<i64: 24, 32>}, {pipeline_mode = #tpu.pipeline_mode<synchronous>, transform_indices = @transform_1, window_bounds = array<i64: 32, 32>}, {pipeline_mode = #tpu.pipeline_mode<synchronous>, transform_indices = @transform_2, window_bounds = array<i64: 1, 32>}, {pipeline_mode = #tpu.pipeline_mode<synchronous>, transform_indices = @transform_3, window_bounds = array<i64: 1, 16>}, {transform_indices = @transform_4, window_bounds = array<i64: 1>}, {pipeline_mode = #tpu.pipeline_mode<synchronous>, transform_indices = @transform_5, window_bounds = array<i64: 32, 4>}, {pipeline_mode = #tpu.pipeline_mode<synchronous>, transform_indices = @transform_6, window_bounds = array<i64: 1, 4>}, {pipeline_mode = #tpu.pipeline_mode<synchronous>, transform_indices = @transform_7, window_bounds = array<i64: 1, 4>}, {pipeline_mode = #tpu.pipeline_mode<synchronous>, transform_indices = @transform_8, window_bounds = array<i64: 1, 24>}]} {
    %c0_i32 = arith.constant 0 : i32
    %0 = arith.cmpi eq, %arg0, %c0_i32 : i32
    %1 = arith.extui %0 : i1 to i32
    %c0_i32_0 = arith.constant 0 : i32
    %2 = arith.cmpi ne, %1, %c0_i32_0 : i32
    scf.if %2 {
      %cst_30 = arith.constant 0xFF800000 : f32
      %58 = vector.broadcast %cst_30 : f32 to vector<1x1xf32>
      %c0_31 = arith.constant 0 : index
      %c0_32 = arith.constant 0 : index
      %59 = vector.load %arg10[%c0_31, %c0_32] : memref<1x1xf32, #tpu.memory_space<vmem>>, vector<1x1xf32>
      tpu.vector_store %arg10[%c0_31, %c0_32], %58 {strides = array<i32>} : memref<1x1xf32, #tpu.memory_space<vmem>>, vector<1x1xf32>,
      %cst_33 = arith.constant 0.000000e+00 : f32
      %60 = vector.broadcast %cst_33 : f32 to vector<1x1xf32>
      %c0_34 = arith.constant 0 : index
      %c0_35 = arith.constant 0 : index
      %61 = vector.load %arg11[%c0_34, %c0_35] : memref<1x1xf32, #tpu.memory_space<vmem>>, vector<1x1xf32>
      tpu.vector_store %arg11[%c0_34, %c0_35], %60 {strides = array<i32>} : memref<1x1xf32, #tpu.memory_space<vmem>>, vector<1x1xf32>,
      %cst_36 = arith.constant 0.000000e+00 : f32
      %62 = vector.broadcast %cst_36 : f32 to vector<1x32xf32>
      %c0_37 = arith.constant 0 : index
      %c0_38 = arith.constant 0 : index
      %63 = vector.load %arg12[%c0_37, %c0_38] : memref<1x32xf32, #tpu.memory_space<vmem>>, vector<1x32xf32>
      tpu.vector_store %arg12[%c0_37, %c0_38], %62 {strides = array<i32>} : memref<1x32xf32, #tpu.memory_space<vmem>>, vector<1x32xf32>,
    } else {
    }
    %c0 = arith.constant 0 : index
    %c0_1 = arith.constant 0 : index
    %3 = vector.load %arg1[%c0, %c0_1] : memref<24x32xf32, #tpu.memory_space<vmem>>, vector<24x32xf32>
    %c0_2 = arith.constant 0 : index
    %c0_3 = arith.constant 0 : index
    %4 = vector.load %arg2[%c0_2, %c0_3] : memref<32x32xf32, #tpu.memory_space<vmem>>, vector<32x32xf32>
    %cst = arith.constant dense<0.000000e+00> : vector<24x32xf32>
    %5 = tpu.matmul %3, %4, %cst {dimension_numbers = #tpu.dot_dimension_numbers<[1], [0], [0], [1], [0, 0, 1, 1], [], []>} : vector<24x32xf32>, vector<32x32xf32>, vector<24x32xf32> -> vector<24x32xf32>
    %c0_4 = arith.constant 0 : index
    %c0_5 = arith.constant 0 : index
    %6 = vector.load %arg3[%c0_4, %c0_5] : memref<1x32xf32, #tpu.memory_space<vmem>>, vector<1x32xf32>
    %7 = vector.broadcast %6 : vector<1x32xf32> to vector<24x32xf32>
    %8 = arith.addf %5, %7 : vector<24x32xf32>
    %9 = vector.extract_strided_slice %8 {offsets = [0, 0], sizes = [24, 16], strides = [1, 1]} : vector<24x32xf32> to vector<24x16xf32>
    %10 = math.tanh %9 : vector<24x16xf32>
    %11 = vector.extract_strided_slice %8 {offsets = [0, 16], sizes = [24, 16], strides = [1, 1]} : vector<24x32xf32> to vector<24x16xf32>
    %12 = arith.negf %11 : vector<24x16xf32>
    %13 = math.exp %12 : vector<24x16xf32>
    %cst_6 = arith.constant 1.000000e+00 : f32
    %14 = vector.broadcast %cst_6 : f32 to vector<24x16xf32>
    %15 = arith.addf %14, %13 : vector<24x16xf32>
    %16 = arith.divf %14, %15 : vector<24x16xf32>
    %17 = arith.mulf %10, %16 : vector<24x16xf32>
    %c0_7 = arith.constant 0 : index
    %c0_8 = arith.constant 0 : index
    %18 = vector.load %arg4[%c0_7, %c0_8] : memref<1x16xf32, #tpu.memory_space<vmem>>, vector<1x16xf32>
    %cst_9 = arith.constant dense<0.000000e+00> : vector<1x24xf32>
    %19 = tpu.matmul %18, %17, %cst_9 {dimension_numbers = #tpu.dot_dimension_numbers<[1], [1], [0], [0], [0, 0, 1, 0], [], []>} : vector<1x16xf32>, vector<24x16xf32>, vector<1x24xf32> -> vector<1x24xf32>
    %c0_10 = arith.constant 0 : index
    %20 = memref.load %arg5[%c0_10] : memref<1xf32, #tpu.memory_space<smem>>
    %21 = vector.broadcast %20 : f32 to vector<1x24xf32>
    %22 = arith.addf %19, %21 : vector<1x24xf32>
    %c24_i32 = arith.constant 24 : i32
    %23 = arith.muli %arg0, %c24_i32 : i32
    %24 = tpu.iota {dimensions = array<i32: 1>} : vector<1x24xi32>
    %25 = vector.broadcast %23 : i32 to vector<1x24xi32>
    %26 = arith.addi %25, %24 : vector<1x24xi32>
    %c20_i32 = arith.constant 20 : i32
    %27 = vector.broadcast %c20_i32 : i32 to vector<1x24xi32>
    %28 = arith.cmpi slt, %26, %27 : vector<1x24xi32>
    %cst_11 = arith.constant 0xFF800000 : f32
    %29 = vector.broadcast %cst_11 : f32 to vector<1x24xf32>
    %30 = arith.select %28, %22, %29 : vector<1x24xi1>, vector<1x24xf32>
    %31 = arith.index_cast %arg0 : i32 to index
    %c0_12 = arith.constant 0 : index
    %32 = vector.load %arg9[%31, %c0_12] : memref<1x24xf32, #tpu.memory_space<vmem>>, vector<1x24xf32>
    tpu.vector_store %arg9[%31, %c0_12], %30 {strides = array<i32>} : memref<1x24xf32, #tpu.memory_space<vmem>>, vector<1x24xf32>,
    %c0_13 = arith.constant 0 : index
    %c0_14 = arith.constant 0 : index
    %33 = vector.load %arg10[%c0_13, %c0_14] : memref<1x1xf32, #tpu.memory_space<vmem>>, vector<1x1xf32>
    %cst_15 = arith.constant dense<0xFF800000> : vector<1xf32>
    %34 = vector.multi_reduction <maximumf>, %30, %cst_15 [1] : vector<1x24xf32> to vector<1xf32>
    %35 = vector.shape_cast %34 : vector<1xf32> to vector<1x1xf32>
    %36 = arith.maximumf %33, %35 : vector<1x1xf32>
    %37 = arith.subf %33, %36 : vector<1x1xf32>
    %38 = math.exp %37 : vector<1x1xf32>
    %39 = vector.broadcast %36 : vector<1x1xf32> to vector<1x24xf32>
    %40 = arith.subf %30, %39 : vector<1x24xf32>
    %41 = math.exp %40 : vector<1x24xf32>
    %c0_16 = arith.constant 0 : index
    %c0_17 = arith.constant 0 : index
    %42 = vector.load %arg11[%c0_16, %c0_17] : memref<1x1xf32, #tpu.memory_space<vmem>>, vector<1x1xf32>
    %43 = arith.mulf %42, %38 : vector<1x1xf32>
    %cst_18 = arith.constant dense<0.000000e+00> : vector<1xf32>
    %44 = vector.multi_reduction <add>, %41, %cst_18 [1] : vector<1x24xf32> to vector<1xf32>
    %45 = vector.shape_cast %44 : vector<1xf32> to vector<1x1xf32>
    %46 = arith.addf %43, %45 : vector<1x1xf32>
    %c0_19 = arith.constant 0 : index
    %c0_20 = arith.constant 0 : index
    %47 = vector.load %arg11[%c0_19, %c0_20] : memref<1x1xf32, #tpu.memory_space<vmem>>, vector<1x1xf32>
    tpu.vector_store %arg11[%c0_19, %c0_20], %46 {strides = array<i32>} : memref<1x1xf32, #tpu.memory_space<vmem>>, vector<1x1xf32>,
    %c0_21 = arith.constant 0 : index
    %c0_22 = arith.constant 0 : index
    %48 = vector.load %arg12[%c0_21, %c0_22] : memref<1x32xf32, #tpu.memory_space<vmem>>, vector<1x32xf32>
    %49 = vector.broadcast %38 : vector<1x1xf32> to vector<1x32xf32>
    %50 = arith.mulf %48, %49 : vector<1x32xf32>
    %cst_23 = arith.constant dense<0.000000e+00> : vector<1x32xf32>
    %51 = tpu.matmul %41, %3, %cst_23 {dimension_numbers = #tpu.dot_dimension_numbers<[1], [0], [0], [1], [0, 0, 1, 1], [], []>} : vector<1x24xf32>, vector<24x32xf32>, vector<1x32xf32> -> vector<1x32xf32>
    %52 = arith.addf %50, %51 : vector<1x32xf32>
    %c0_24 = arith.constant 0 : index
    %c0_25 = arith.constant 0 : index
    %53 = vector.load %arg12[%c0_24, %c0_25] : memref<1x32xf32, #tpu.memory_space<vmem>>, vector<1x32xf32>
    tpu.vector_store %arg12[%c0_24, %c0_25], %52 {strides = array<i32>} : memref<1x32xf32, #tpu.memory_space<vmem>>, vector<1x32xf32>,
    %c0_26 = arith.constant 0 : index
    %c0_27 = arith.constant 0 : index
    %54 = vector.load %arg10[%c0_26, %c0_27] : memref<1x1xf32, #tpu.memory_space<vmem>>, vector<1x1xf32>
    tpu.vector_store %arg10[%c0_26, %c0_27], %36 {strides = array<i32>} : memref<1x1xf32, #tpu.memory_space<vmem>>, vector<1x1xf32>,
    %c0_i32_28 = arith.constant 0 : i32
    %55 = arith.cmpi eq, %arg0, %c0_i32_28 : i32
    %56 = arith.extui %55 : i1 to i32
    %c0_i32_29 = arith.constant 0 : i32
    %57 = arith.cmpi ne, %56, %c0_i32_29 : i32
    scf.if %57 {
      %c0_30 = arith.constant 0 : index
      %c0_31 = arith.constant 0 : index
      %58 = vector.load %arg11[%c0_30, %c0_31] : memref<1x1xf32, #tpu.memory_space<vmem>>, vector<1x1xf32>
      %cst_32 = arith.constant 1.000000e+00 : f32
      %59 = vector.broadcast %cst_32 : f32 to vector<1x1xf32>
      %60 = arith.divf %59, %58 : vector<1x1xf32>
      %c0_33 = arith.constant 0 : index
      %c0_34 = arith.constant 0 : index
      %61 = vector.load %arg9[%c0_33, %c0_34] : memref<1x24xf32, #tpu.memory_space<vmem>>, vector<1x24xf32>
      %c0_35 = arith.constant 0 : index
      %c0_36 = arith.constant 0 : index
      %62 = vector.load %arg10[%c0_35, %c0_36] : memref<1x1xf32, #tpu.memory_space<vmem>>, vector<1x1xf32>
      %63 = vector.broadcast %62 : vector<1x1xf32> to vector<1x24xf32>
      %64 = arith.subf %61, %63 : vector<1x24xf32>
      %65 = math.exp %64 : vector<1x24xf32>
      %66 = vector.broadcast %60 : vector<1x1xf32> to vector<1x24xf32>
      %67 = arith.mulf %65, %66 : vector<1x24xf32>
      %c0_37 = arith.constant 0 : index
      %c0_38 = arith.constant 0 : index
      %68 = vector.load %arg9[%c0_37, %c0_38] : memref<1x24xf32, #tpu.memory_space<vmem>>, vector<1x24xf32>
      tpu.vector_store %arg9[%c0_37, %c0_38], %67 {strides = array<i32>} : memref<1x24xf32, #tpu.memory_space<vmem>>, vector<1x24xf32>,
      %c0_39 = arith.constant 0 : index
      %c0_40 = arith.constant 0 : index
      %69 = vector.load %arg12[%c0_39, %c0_40] : memref<1x32xf32, #tpu.memory_space<vmem>>, vector<1x32xf32>
      %70 = vector.broadcast %60 : vector<1x1xf32> to vector<1x32xf32>
      %71 = arith.mulf %69, %70 : vector<1x32xf32>
      %c0_41 = arith.constant 0 : index
      %c0_42 = arith.constant 0 : index
      %72 = vector.load %arg6[%c0_41, %c0_42] : memref<32x4xf32, #tpu.memory_space<vmem>>, vector<32x4xf32>
      %cst_43 = arith.constant dense<0.000000e+00> : vector<1x4xf32>
      %73 = tpu.matmul %71, %72, %cst_43 {dimension_numbers = #tpu.dot_dimension_numbers<[1], [0], [0], [1], [0, 0, 1, 1], [], []>} : vector<1x32xf32>, vector<32x4xf32>, vector<1x4xf32> -> vector<1x4xf32>
      %c0_44 = arith.constant 0 : index
      %c0_45 = arith.constant 0 : index
      %74 = vector.load %arg7[%c0_44, %c0_45] : memref<1x4xf32, #tpu.memory_space<vmem>>, vector<1x4xf32>
      %75 = arith.addf %73, %74 : vector<1x4xf32>
      %c0_46 = arith.constant 0 : index
      %c0_47 = arith.constant 0 : index
      %76 = vector.load %arg8[%c0_46, %c0_47] : memref<1x4xf32, #tpu.memory_space<vmem>>, vector<1x4xf32>
      tpu.vector_store %arg8[%c0_46, %c0_47], %75 {strides = array<i32>} : memref<1x4xf32, #tpu.memory_space<vmem>>, vector<1x4xf32>,
    } else {
    }
    return
  }
  func.func @transform_0(%arg0: i32) -> (i32, i32) {
    %c0_i32 = arith.constant 0 : i32
    %c0_i32_0 = arith.constant 0 : i32
    return %arg0, %c0_i32 : i32, i32
  }
  func.func @transform_1(%arg0: i32) -> (i32, i32) {
    %c0_i32 = arith.constant 0 : i32
    %c0_i32_0 = arith.constant 0 : i32
    %c0_i32_1 = arith.constant 0 : i32
    return %c0_i32, %c0_i32_0 : i32, i32
  }
  func.func @transform_2(%arg0: i32) -> (i32, i32) {
    %c0_i32 = arith.constant 0 : i32
    %c0_i32_0 = arith.constant 0 : i32
    %c0_i32_1 = arith.constant 0 : i32
    return %c0_i32, %c0_i32_0 : i32, i32
  }
  func.func @transform_3(%arg0: i32) -> (i32, i32) {
    %c0_i32 = arith.constant 0 : i32
    %c0_i32_0 = arith.constant 0 : i32
    %c0_i32_1 = arith.constant 0 : i32
    return %c0_i32, %c0_i32_0 : i32, i32
  }
  func.func @transform_4(%arg0: i32) -> i32 {
    %c0_i32 = arith.constant 0 : i32
    %c0_i32_0 = arith.constant 0 : i32
    return %c0_i32 : i32
  }
  func.func @transform_5(%arg0: i32) -> (i32, i32) {
    %c0_i32 = arith.constant 0 : i32
    %c0_i32_0 = arith.constant 0 : i32
    %c0_i32_1 = arith.constant 0 : i32
    return %c0_i32, %c0_i32_0 : i32, i32
  }
  func.func @transform_6(%arg0: i32) -> (i32, i32) {
    %c0_i32 = arith.constant 0 : i32
    %c0_i32_0 = arith.constant 0 : i32
    %c0_i32_1 = arith.constant 0 : i32
    return %c0_i32, %c0_i32_0 : i32, i32
  }
  func.func @transform_7(%arg0: i32) -> (i32, i32) {
    %c0_i32 = arith.constant 0 : i32
    %c0_i32_0 = arith.constant 0 : i32
    %c0_i32_1 = arith.constant 0 : i32
    return %c0_i32, %c0_i32_0 : i32, i32
  }
  func.func @transform_8(%arg0: i32) -> (i32, i32) {
    %c0_i32 = arith.constant 0 : i32
    %c0_i32_0 = arith.constant 0 : i32
    %c0_i32_1 = arith.constant 0 : i32
    return %c0_i32, %c0_i32_0 : i32, i32
  }
}

</mosaic_0001>

<bundles_post_ra>
// kernel: tpu_custom_call.1
= control target key start
LH: loop header
LB: loop body
LE: loop exit
PB: predicated region body
PF: predicated region fallthrough
CT: control target
= control target key end

     0   :  { %15 = vsyncpa [#allocation7], 0  ;;  %s936_s0 = inlined_call_operand.hbm [shape: f32[24,32], index: 0, kind: input, shape index: {}]   ;;  %s937_s1 = inlined_call_operand.vmem [shape: f32[32,32], index: 1, kind: input, shape index: {}]   ;;  %s938_s2 = inlined_call_operand.vmem [shape: f32[1,32], index: 2, kind: input, shape index: {}]   ;;  %s939_s3 = inlined_call_operand.vmem [shape: f32[1,16], index: 3, kind: input, shape index: {}]   ;;  %s940_s4 = inlined_call_operand.<no memory space> [shape: f32[1], index: 4, kind: input, shape index: {}]   ;;  %s941_s5 = inlined_call_operand.vmem [shape: f32[32,4], index: 5, kind: input, shape index: {}]   ;;  %s942_s6 = inlined_call_operand.vmem [shape: f32[1,4], index: 6, kind: input, shape index: {}]   ;;  %s943_s7 = inlined_call_operand.hbm [shape: f32[1,4], index: 7, kind: output, shape index: {0}]   ;;  %s944_s8 = inlined_call_operand.hbm [shape: f32[1,24], index: 8, kind: output, shape index: {1}]  }
   0x1   :  { %16 = vsyncpa [#allocation8], 0 }
   0x2   :  { %17 = vsyncpa [#allocation11], 0  ;;  %s757_s27 = smov [#allocation6]   ;;  %s685_s9 = scalar_lea.hbm %s936_s0, 384 }
   0x3   :  { %s23_s28 = sshll.u32 %s757_s27, 4  ;;  %p686_p0 = scmp.ne.s32.totalorder %s936_s0, %s685_s9  ;;  %s24_s28 = int_to_ptr.vmem [resolvable:$true] %s23_s28 }
   0x4   :  { %p689_p1 = scmp.lt.u32.totalorder %s685_s9, %s936_s0 }
   0x6   :  { %p691_p2 = pnand %p689_p1, %p686_p0 }
   0x8   :  { %694 = shalt.err (!%p691_p2)
}
   0x9   :  { %s695_s14 = scalar_lea.vmem %s24_s28, 384  ;;  %p700_p4 = scmp.lt.s32.totalorder %s24_s28, %s24_s28 }
   0xa   :  { %p696_p3 = scmp.ne.s32.totalorder %s24_s28, %s695_s14  ;;  %p701_p5 = scmp.lt.s32.totalorder %s695_s14, %s695_s14 }
   0xc   :  { %p702_p6 = por %p701_p5, %p700_p4 }
   0xe   :  { %p703_p7 = pnand %p702_p6, %p696_p3 }
  0x10   :  { %706 = shalt.err (!%p703_p7)
}
  0x11   :  { %s758_s15 = smov 128   ;;  %s759_s16 = smov 8  }
  0x12   :  { %29 = dma.hbm_to_vmem [thread:$0]  %s936_s0, 384, %s24_s28, [#allocation7], %s758_s15, %s758_s15, %s759_s16  }
  0x13   :  { %751 = dma.done.wait [#allocation7], 384  }
  0x14   :  { %752 = vsyncadd [#allocation7], 4294966912  ;;  %v760_v0 = vmov 0.0|0.0   ;;  %vm761_vm0 = vmmov 0   ;;  %v762_v1 = vmov 0.0   ;;  %v57_v2 = vld [vmem:[%s937_s1] sm:$0xff]  ;;  %v281_v46 = vlaneseq }
  0x15   :  { %627 = vmatprep.subr.bf16.mxu0 %v760_v0  ;;  %589 = vmatprep.mubr.msk.f32.mxu0 %vm761_vm0, %v762_v1  ;;  %v58_v3 = vld [vmem:[%s937_s1 + $0x8] sm:$0xff]  ;;  %v59_v4 = vld [vmem:[%s937_s1 + $0x10] sm:$0xff]  ;;  %v60_v6 = vld [vmem:[%s937_s1 + $0x18] sm:$0xff]  ;;  %vm68_vm1 = vcmask 261120   ;;  %vm197_vm2 = vcmask 130048   ;;  %vm49_vm4 = vcmask 0   ;;  %v196_v48 = vstv %s940_s4 }
  0x16   :  { %633 = vmatprep.subr.bf16.mxu1 %v760_v0  ;;  %604 = vmatprep.mubr.msk.f32.mxu1 %vm761_vm0, %v762_v1  ;;  %v628_v5 = vpack.c.bf16 %v58_v3, %v57_v2  ;;  %v843_v7 = vld [vmem:[#allocation6] sm:$0xff]  ;;  %v845_v8 = vld [vmem:[#allocation6 + $0x8] sm:$0xff]  ;;  %v631_v10 = vpack.c.bf16 %v60_v6, %v59_v4  ;;  %v56_v11 = vld [vmem:[#allocation6 + $0x10] sm:$0xff]  ;;  %v764_v45 = vmov -inf   ;;  %51 = vst.msk [vmem:[#allocation3] sm:$0x1] %vm49_vm4, %v762_v1 }
  0x17   :  { %v638_v9 = vpack.c.bf16 %v845_v8, %v843_v7  ;;  %v548_v12 = vld [vmem:[%s938_s2] ss:$0 sm:$0xff]  ;;  %s763_s2 = smov 112   ;;  %vm635_vm3 = vmpackc.low %vm197_vm2, %vm197_vm2  ;;  %50 = vst.msk [vmem:[#allocation2] sm:$0x1] %vm49_vm4, %v764_v45  ;;  %v282_v47 = vand.u32 127, %v281_v46 }
  0x18   :  { %629 = vmatpush3.bf16.msra.mxu0 %v628_v5  ;;  %v194_v44 = vld [vmem:[%s939_s3] sm:$0x1]  ;;  %vm287_vm6 = vcmask 188416   ;;  %v765_v54 = vmov 0   ;;  %vm52_vm7 = vcmask 253952   ;;  %v303_v62 = vshrl.u32 %v281_v46, 7 }
  0x19   :  { %630 = vmatprep.subr.bf16.mxu0 %v760_v0  ;;  %vm285_vm5 = vcmp.lt.s32.totalorder %v282_v47, 20  ;;  %657 = vset.pattern.permute.xlu0 %v765_v54  ;;  %53 = vst.msk [vmem:[#allocation4] sm:$0x1] %vm52_vm7, %v762_v1  ;;  %vm328_vm8 = vcmask 195584  }
  0x1a   :  { %658 = vset.pattern.permute.xlu1 %v765_v54  ;;  %v304_v63 = vsub.s32 0, %v303_v62 }
  0x1c   :  { %632 = vmatpush3.bf16.msra.mxu0 %v631_v10 }
  0x1d   :  { %640 = vmatprep.subr.bf16.mxu0 %v760_v0 }
  0x1e   :  { %v289_v55 = vld [vmem:[#allocation2] sm:$0x1] }
  0x1f   :  { %590 = vmatmul.mubr.msk.f32.vlgmr.msra.gmra.mrb[0].mxu0 %vm68_vm1, %v843_v7 }
  0x20   :  { %592 = vmatprep.mubr.msk.f32.mxu0 %vm761_vm0, %v762_v1 }
  0x23   :  { %593 = vmatmul.mubr.msk.f32.gmra.mrb[2].mxu0 %vm68_vm1, %v845_v8  ;;  %v440_v8 = vld [vmem:[%s941_s5 + $0x8] sm:$0xff] }
  0x24   :  { %595 = vmatprep.mubr.msk.f32.mxu0 %vm761_vm0, %v762_v1 }
  0x27   :  { %596 = vmatmul.mubr.msk.f32.gmra.mrb[4].mxu0 %vm68_vm1, %v56_v11 }
  0x28   :  { %624 = vmatprep.mubr.msk.f32.mxu0 %vm761_vm0, %v762_v1 }
  0xf2   :  { %v144_v13 = vpop.f32.mrb[0].mxu0 }
  0xf3   :  { %v145_v14 = vadd.f32 %v548_v12, %v144_v13  ;;  %v591_v15 = vpop.f32.mrb[1].mxu0  ;;  %v309_v13 = vld [vmem:[#allocation3] sm:$0x1] }
  0xf5   :  { %v552_v16 = vmul.f32 -1.442695, %v145_v14 }
  0xf6   :  { %v149_v17 = vpop.f32.mrb[2].mxu0 }
  0xf7   :  { %659 = vpow2.f32 %v552_v16  ;;  %v150_v18 = vadd.f32 %v548_v12, %v149_v17  ;;  %v594_v19 = vpop.f32.mrb[3].mxu0 }
  0xf9   :  { %v553_v20 = vmul.f32 -1.442695, %v150_v18 }
  0xfa   :  { %v154_v21 = vpop.f32.mrb[4].mxu0 }
  0xfb   :  { %661 = vpow2.f32 %v553_v20  ;;  %v155_v22 = vadd.f32 %v548_v12, %v154_v21  ;;  %v597_v23 = vpop.f32.mrb[5].mxu0  ;;  %v317_v21 = vld [vmem:[#allocation4] sm:$0x1] }
  0xfd   :  { %v554_v24 = vmul.f32 -1.442695, %v155_v22 }
  0xff   :  { %663 = vpow2.f32 %v554_v24 }
 0x101   :  { %v660_v25 = vpop.eup %659 }
 0x102   :  { %v170_v26 = vadd.f32 1.0, %v660_v25 }
 0x104   :  { %665 = vrcp.f32 %v170_v26 }
 0x105   :  { %v662_v27 = vpop.eup %661 }
 0x106   :  { %v171_v28 = vadd.f32 1.0, %v662_v27 }
 0x108   :  { %667 = vrcp.f32 %v171_v28 }
 0x109   :  { %v664_v29 = vpop.eup %663 }
 0x10a   :  { %v172_v30 = vadd.f32 1.0, %v664_v29 }
 0x10c   :  { %669 = vrcp.f32 %v172_v30 }
 0x10d   :  { %671 = vtanh.f32 %v145_v14 }
 0x10e   :  { %v666_v31 = vpop.eup %665  ;;  %673 = vtanh.f32 %v150_v18 }
 0x10f   :  { %182 = vrot.lane.b32.xlu0 %v666_v31, %s763_s2  ;;  %675 = vtanh.f32 %v155_v22 }
 0x112   :  { %v668_v32 = vpop.eup %667 }
 0x113   :  { %184 = vrot.lane.b32.xlu0 %v668_v32, %s763_s2 }
 0x116   :  { %v670_v33 = vpop.eup %669 }
 0x117   :  { %186 = vrot.lane.b32.xlu1 %v670_v33, %s763_s2  ;;  %v672_v35 = vpop.eup %671 }
 0x118   :  { %v674_v36 = vpop.eup %673 }
 0x119   :  { %v676_v42 = vpop.eup %675 }
 0x181   :  { %v183_v34 = vpop.permute.xlu0 %182 }
 0x182   :  { %v191_v38 = vmul.f32 %v672_v35, %v183_v34 }
 0x185   :  { %v185_v37 = vpop.permute.xlu0 %184 }
 0x186   :  { %v192_v39 = vmul.f32 %v674_v36, %v185_v37 }
 0x188   :  { %v634_v40 = vpack.c.bf16 %v192_v39, %v191_v38 }
 0x189   :  { %v187_v41 = vpop.permute.xlu1 %186 }
 0x18a   :  { %636 = vmatpush3.bf16.xpose.msk.msra.mxu1 %vm635_vm3, %v634_v40  ;;  %v193_v43 = vmul.f32 %v676_v42, %v187_v41 }
 0x18b   :  { %602 = vmatprep.subr.mxu1 %v762_v1 }
 0x192   :  { %603 = vmatpush3.xpose.msk.msra.mxu1 %vm197_vm2, %v193_v43 }
 0x193   :  { %637 = vmatprep.subr.bf16.mxu1 %v760_v0 }
 0x195   :  { %605 = vmatmul.mubr.msk.f32.vlgmr.msra.gmra.mrb[0].mxu1 %vm197_vm2, %v194_v44 }
 0x196   :  { %639 = vmatpush3.bf16.msra.mxu1 %v638_v9  ;;  %613 = vmatprep.mubr.msk.f32.mxu1 %vm761_vm0, %v762_v1  ;;  %v441_v9 = vld [vmem:[%s941_s5 + $0x10] sm:$0xff] }
 0x197   :  { %611 = vmatprep.subr.mxu1 %v762_v1  ;;  %v439_v1 = vld [vmem:[%s941_s5] sm:$0xff] }
 0x198   :  { %v641_v10 = vpack.c.bf16 %v440_v8, %v439_v1 }
 0x19a   :  { %612 = vmatpush3.msra.mxu1 %v56_v11  ;;  %v442_v11 = vld [vmem:[%s941_s5 + $0x18] sm:$0xff]  ;;  %642 = vmatpush3.bf16.msra.mxu0 %v641_v10  ;;  %s766_s5 = smov [#allocation10]  }
 0x19b   :  { %v644_v12 = vpack.c.bf16 %v442_v11, %v441_v9  ;;  %643 = vmatprep.subr.bf16.mxu0 %v760_v0  ;;  %s535_s15 = sshll.u32 %s766_s5, 4  ;;  %s536_s15 = int_to_ptr.vmem [resolvable:$true] %s535_s15 }
 0x19c   :  { %s707_s16 = scalar_lea.vmem %s536_s15, 16  ;;  %s711_s17 = scalar_lea.vmem %s536_s15, 32 }
 0x19d   :  { %p708_p8 = scmp.ne.s32.totalorder %s536_s15, %s707_s16  ;;  %p712_p9 = scmp.lt.s32.totalorder %s536_s15, %s536_s15 }
 0x19e   :  { %645 = vmatpush3.bf16.msra.mxu0 %v644_v12  ;;  %p713_p10 = scmp.lt.s32.totalorder %s711_s17, %s707_s16 }
 0x1a0   :  { %p714_p11 = por %p713_p10, %p712_p9 }
 0x1a2   :  { %p715_p12 = pnand %p714_p11, %p708_p8 }
 0x268   :  { %v276_v49 = vpop.f32.mrb[0].mxu1 }
 0x269   :  { %v277_v50 = vadd.f32 %v276_v49, %v196_v48  ;;  %v606_v51 = vpop.f32.mrb[1].mxu1 }
 0x26b   :  { %v286_v52 = vsel %vm285_vm5, %v277_v50, -inf }
 0x26c   :  { %v290_v53 = vsel %vm287_vm6, %v286_v52, -inf  ;;  %288 = vst.msk [vmem:[#allocation10] sm:$0x1] %vm287_vm6, %v286_v52 }
 0x26d   :  { %291 = vmax.xlane.f32.xlu1 %v290_v53 }
 0x273   :  { %v412_v27 = vld [vmem:[#allocation10] sm:$0x1] }
 0x2fa   :  { %v292_v56 = vpop.xlane.xlu1 %291 }
 0x2fb   :  { %v293_v57 = vmax.f32 %v289_v55, %v292_v56 }
 0x2fd   :  { %v294_v58 = vsub.f32 %v289_v55, %v293_v57  ;;  %405 = vst.msk [vmem:[#allocation2] sm:$0x1] %vm49_vm4, %v293_v57  ;;  %299 = vperm.xlu0 %657, %v293_v57  }
 0x2ff   :  { %v295_v59 = vmul.f32 1.442695, %v294_v58 }
 0x301   :  { %677 = vpow2.f32 %v295_v59 }
 0x304   :  { %v413_v61 = vld [vmem:[#allocation2] sm:$0x1] }
 0x30b   :  { %v678_v60 = vpop.eup %677 }
 0x30c   :  { %320 = vperm.xlu1 %658, %v678_v60   ;;  %v310_v14 = vmul.f32 %v678_v60, %v309_v13 }
 0x310   :  { %416 = vperm.xlu1 %658, %v413_v61  }
 0x37c   :  { %v300_v2 = vpop.permute.xlu0 %299 }
 0x37d   :  { %v305_v3 = vrot.slane %v300_v2, %v304_v63 }
 0x37f   :  { %v306_v4 = vsub.f32 %v286_v52, %v305_v3 }
 0x381   :  { %v307_v5 = vmul.f32 1.442695, %v306_v4 }
 0x383   :  { %679 = vpow2.f32 %v307_v5 }
 0x38b   :  { %v321_v19 = vpop.permute.xlu1 %320 }
 0x38c   :  { %v326_v20 = vrot.slane %v321_v19, %v304_v63 }
 0x38d   :  { %v680_v6 = vpop.eup %679 }
 0x38e   :  { %614 = vmatmul.mubr.msk.f32.vlgmr.msra.gmra.mrb[2].mxu1 %vm328_vm8, %v680_v6  ;;  %v311_v7 = vsel %vm287_vm6, %v680_v6, 0.0  ;;  %v327_v22 = vmul.f32 %v326_v20, %v317_v21 }
 0x38f   :  { %312 = vadd.xlane.f32.xlu0 %v311_v7  ;;  %v417_v0 = vpop.permute.xlu1 %416 }
 0x390   :  { %v422_v26 = vrot.slane %v417_v0, %v304_v63 }
 0x392   :  { %v423_v28 = vsub.f32 %v412_v27, %v422_v26 }
 0x394   :  { %v424_v29 = vmul.f32 1.442695, %v423_v28 }
 0x41c   :  { %v313_v15 = vpop.xlane.xlu0 %312 }
 0x41d   :  { %v314_v16 = vadd.f32 %v313_v15, %v310_v14 }
 0x41f   :  { %316 = vst.msk [vmem:[#allocation3] sm:$0x1] %vm49_vm4, %v314_v16 }
 0x426   :  { %v409_v17 = vld [vmem:[#allocation3] sm:$0x1] }
 0x427   :  { %681 = vrcp.f32 %v409_v17 }
 0x428   :  { %683 = vpow2.f32 %v424_v29 }
 0x431   :  { %v682_v18 = vpop.eup %681 }
 0x432   :  { %428 = vperm.xlu0 %657, %v682_v18   ;;  %v684_v32 = vpop.eup %683 }
 0x461   :  { %v398_v23 = vpop.f32.mrb[2].mxu1 }
 0x462   :  { %v402_v24 = vadd.f32 %v398_v23, %v327_v22  ;;  %v615_v25 = vpop.f32.mrb[3].mxu1 }
 0x464   :  { %404 = vst.msk [vmem:[#allocation4] sm:$0x1] %vm52_vm7, %v402_v24 }
 0x46b   :  { %v437_v33 = vld [vmem:[#allocation4] sm:$0x1] }
 0x4b1   :  { %v429_v30 = vpop.permute.xlu0 %428 }
 0x4b2   :  { %v434_v31 = vrot.slane %v429_v30, %v304_v63 }
 0x4b4   :  { %v435_v34 = vmul.f32 %v684_v32, %v434_v31  ;;  %v438_v35 = vmul.f32 %v437_v33, %v434_v31 }
 0x4b6   :  { %436 = vst.msk [vmem:[#allocation10] sm:$0x1] %vm287_vm6, %v435_v34  ;;  %625 = vmatmul.mubr.msk.f32.vlgmr.msra.gmra.mrb[6].mxu0 %vm68_vm1, %v438_v35 }
 0x4b7   :  { %718 = shalt.err (!%p715_p12)
}
 0x4b8   :  { %s719_s20 = scalar_lea.hbm %s944_s8, 16 }
 0x4b9   :  { %p720_p13 = scmp.ne.s32.totalorder %s944_s8, %s719_s20  ;;  %p723_p0 = scmp.lt.u32.totalorder %s719_s20, %s944_s8 }
 0x4bb   :  { %p725_p1 = pnand %p723_p0, %p720_p13 }
 0x4bd   :  { %728 = shalt.err (!%p725_p1)
}
 0x4be   :  { %538 = dma.vmem_to_hbm [thread:$0]  %s536_s15, 16, %s944_s8, [#allocation11]   ;;  %v443_v36 = vld [vmem:[%s942_s6] sm:$0x1]  ;;  %vm517_vm9 = vcmask 24576  }
 0x4bf   :  { %s767_s2 = smov [#allocation9]  }
 0x4c0   :  { %s525_s27 = sshll.u32 %s767_s2, 4  ;;  %s526_s27 = int_to_ptr.vmem [resolvable:$true] %s525_s27 }
 0x4c1   :  { %s729_s28 = scalar_lea.vmem %s526_s27, 16  ;;  %s733_s3 = scalar_lea.vmem %s526_s27, 32 }
 0x4c2   :  { %p730_p2 = scmp.ne.s32.totalorder %s526_s27, %s729_s28  ;;  %p734_p3 = scmp.lt.s32.totalorder %s526_s27, %s526_s27 }
 0x4c3   :  { %p735_p4 = scmp.lt.s32.totalorder %s733_s3, %s729_s28 }
 0x4c5   :  { %p736_p5 = por %p735_p4, %p734_p3 }
 0x4c7   :  { %p737_p6 = pnand %p736_p5, %p730_p2 }
 0x589   :  { %v513_v37 = vpop.f32.mrb[6].mxu0 }
 0x58a   :  { %v514_v38 = vadd.f32 %v513_v37, %v443_v36  ;;  %v626_v39 = vpop.f32.mrb[7].mxu0 }
 0x58c   :  { %518 = vst.msk [vmem:[#allocation9] sm:$0x1] %vm517_vm9, %v514_v38 }
 0x58d   :  { %740 = shalt.err (!%p737_p6)
}
 0x58e   :  { %s741_s6 = scalar_lea.hbm %s943_s7, 16 }
 0x58f   :  { %p742_p7 = scmp.ne.s32.totalorder %s943_s7, %s741_s6  ;;  %p745_p8 = scmp.lt.u32.totalorder %s741_s6, %s943_s7 }
 0x591   :  { %p747_p9 = pnand %p745_p8, %p742_p7 }
 0x593   :  { %750 = shalt.err (!%p747_p9)
}
 0x594   :  { %528 = dma.vmem_to_hbm [thread:$0]  %s526_s27, 16, %s943_s7, [#allocation8]  }
 0x595   :  { %753 = dma.done.wait [#allocation8], 16  }
 0x596   :  { %754 = vsyncadd [#allocation8], 4294967280 }
 0x597   :  { %755 = dma.done.wait [#allocation11], 16  }
 0x598   :  { %756 = vsyncadd [#allocation11], 4294967280 }
 0x599   :  { %545 = vsyncpa [#allocation7], 1 }
 0x59a   :  { %546 = vsyncpa [#allocation8], 1 }
 0x59b   :  { %547 = vsyncpa [#allocation11], 1 }

</bundles_post_ra>
